<compile_context>
chip_gen: v7x
topology: tpu7x:2x2x1
jax: 0.10.0
libtpu: 0.0.40
codegen_flags: <defaults>
</compile_context>

<pallas_src>
import functools
import math

import jax
import jax.numpy as jnp
from jax.experimental import pallas as pl
from jax.experimental.pallas import tpu as pltpu


def _maxpool_stride1_kernel(x_ref, o_ref, *, H, W):
    # Block: (bc, L) rows; each row is K whole (H, W) planes flattened, L = K*H*W.
    x = x_ref[...]
    L = x.shape[-1]
    HW = H * W

    # Edge masks at (1, L): broadcast across the bc sublanes inside jnp.where
    # instead of materializing a (bc, L) int32 iota (saves VALU work / vregs).
    col = jax.lax.broadcasted_iota(jnp.int32, (1, L), dimension=1)
    last_col = (col % W) == (W - 1)           # w == W-1  -> replicate right edge
    last_row = (col % HW) >= (H - 1) * W      # h == H-1  -> replicate bottom edge

    # Right neighbour: pull flat index i+1 into position i (jnp.roll semantics),
    # then clamp the last column of every plane back to itself (replicate pad).
    x_r = pltpu.roll(x, (L - 1) % L, axis=1)
    m = jnp.maximum(x, jnp.where(last_col, x, x_r))

    # Bottom neighbour of the row-max: flat index i+W, clamp the last plane row.
    m_d = pltpu.roll(m, (L - W) % L, axis=1)
    o_ref[...] = jnp.maximum(m, jnp.where(last_row, m, m_d))


def _target_block_bytes():
    """Per-grid-step input-block byte target (generation-aware).

    Double-buffered in+out costs ~4x this, so 2 MiB (v5e: 16 MiB default scoped
    VMEM) / 4 MiB (v6e, v7x: 32 MiB default) stays comfortably under the default
    limit with no vmem_limit_bytes override."""
    try:
        kind = jax.devices()[0].device_kind.lower()
    except Exception:
        kind = ""
    if "v6" in kind or "v7" in kind:
        return 4 << 20
    return 2 << 20                             # v5e / unknown: conservative


def _pick_lane_pack(nc, hw, itemsize, target_bytes):
    """Channel planes packed per lane row.

    K=1 if H*W is already a multiple of 128.  Otherwise pick the smallest
    divisor K of NC with (K*H*W) % 128 == 0 (fully unmasked vld/vst); failing
    that, at least a few hundred lanes per row."""
    if hw % 128 == 0 or nc <= 1:
        return 1
    k_aligned = 128 // math.gcd(hw, 128)       # smallest k with (k*hw) % 128 == 0
    max_k = max(1, target_bytes // (hw * itemsize))   # one row must fit a block
    fallback = 1
    for k in range(2, min(nc, max_k) + 1):
        if nc % k:
            continue
        if k % k_aligned == 0:
            return k
        if fallback == 1 and k * hw >= 512:
            fallback = k
    return fallback


def _pick_block_rows(nrows, row_bytes, itemsize, target_bytes):
    """Rows per block: never overshoot the byte target, dtype-aware sublane
    alignment, and >=2 (up to 8) grid steps when possible (v7x has 2 TCs)."""
    sub = max(8, 32 // itemsize)               # sublane pack: 8 f32 / 16 bf16 / 32 i8
    bc = min(nrows, max(1, target_bytes // row_bytes))   # cap: bc*row_bytes <= target
    max_steps = nrows // sub                   # grid steps possible at aligned blocks
    if max_steps >= 2:
        bc = min(bc, pl.cdiv(nrows, min(8, max_steps)))
    if bc < nrows and bc >= sub:
        bc = (bc // sub) * sub                 # align DOWN: never overshoot target
    # TODO(synk): a single row larger than the target (huge H*W planes, e.g.
    # 2048x2048) needs an H-tiled path with a one-row halo to stay inside v7x's
    # 64 MiB VMEM; not needed for the YOLO feature-map sizes this module sees.
    return max(1, bc)


def maxpool_stride1(x):
    """2x2 max pool, stride 1, replicate pad on right/bottom. NCHW in/out."""
    N, C, H, W = x.shape
    NC, HW = N * C, H * W
    itemsize = x.dtype.itemsize
    target = _target_block_bytes()

    K = _pick_lane_pack(NC, HW, itemsize, target)
    rows, L = NC // K, K * HW
    xf = x.reshape(rows, L)                    # free reshape (contiguous dims)

    bc = _pick_block_rows(rows, L * itemsize, itemsize, target)
    grid = (pl.cdiv(rows, bc),)
    kernel = functools.partial(_maxpool_stride1_kernel, H=H, W=W)

    out = pl.pallas_call(
        kernel,
        out_shape=jax.ShapeDtypeStruct((rows, L), x.dtype),
        grid=grid,
        in_specs=[pl.BlockSpec((bc, L), lambda i: (i, 0))],
        out_specs=pl.BlockSpec((bc, L), lambda i: (i, 0)),
        compiler_params=pltpu.CompilerParams(
            dimension_semantics=("parallel",)),
        cost_estimate=pl.CostEstimate(
            flops=3 * NC * HW,
            transcendentals=0,
            bytes_accessed=2 * NC * HW * itemsize),
    )(xf)
    return out.reshape(N, C, H, W)


def _reference(x):
    # Pure-JAX reference of the PyTorch forward: replicate-pad right/bottom by 1,
    # then 2x2 window max with stride 1.
    xp = jnp.pad(x, ((0, 0), (0, 0), (0, 1), (0, 1)), mode="edge")
    return jnp.maximum(
        jnp.maximum(xp[:, :, :-1, :-1], xp[:, :, :-1, 1:]),
        jnp.maximum(xp[:, :, 1:, :-1], xp[:, :, 1:, 1:]),
    )


if __name__ == "__main__":
    key = jax.random.PRNGKey(0)
    tests = [
        ((2, 4, 16, 16), jnp.float32),      # H*W multiple of 128 (lane-dense as-is)
        ((2, 128, 13, 13), jnp.float32),    # non-pow2 W; lane-packs 128 planes/row
        ((2, 16, 14, 14), jnp.bfloat16),    # bf16 path; lane-packs 32 planes/row
        ((2, 100, 16, 16), jnp.float32),    # multi-step grid with a partial block
    ]
    for i, (shape, dtype) in enumerate(tests):
        k = jax.random.fold_in(key, i)
        x = jax.random.normal(k, shape, dtype=jnp.float32).astype(dtype)
        y = jax.block_until_ready(maxpool_stride1(x))
        y_ref = _reference(x)
        assert y.shape == x.shape and y.dtype == x.dtype, (shape, dtype)
        assert jnp.array_equal(y, y_ref), (shape, dtype)
    print("KERNEL_OK")
</pallas_src>

<mosaic_0001>
module attributes {stable_mosaic.version = 11 : i64} {
  func.func @_maxpool_stride1_kernel(%arg0: i32, %arg1: memref<8x256xf32, #tpu.memory_space<vmem>>, %arg2: memref<8x256xf32, #tpu.memory_space<vmem>>) attributes {dimension_semantics = [#tpu.dimension_semantics<parallel>], iteration_bounds = array<i64: 1>, scalar_prefetch = 0 : i64, scratch_operands = 0 : i64, tpu.core_type = #tpu.core_type<tc>, window_params = [{transform_indices = @transform_0, window_bounds = array<i64: 8, 256>}, {transform_indices = @transform_1, window_bounds = array<i64: 8, 256>}]} {
    %c0 = arith.constant 0 : index
    %c0_0 = arith.constant 0 : index
    %0 = vector.load %arg1[%c0, %c0_0] : memref<8x256xf32, #tpu.memory_space<vmem>>, vector<8x256xf32>
    %1 = tpu.iota {dimensions = array<i32: 1>} : vector<1x256xi32>
    %c16_i32 = arith.constant 16 : i32
    %c0_i32 = arith.constant 0 : i32
    %2 = arith.cmpi eq, %c16_i32, %c0_i32 : i32
    %c1_i32 = arith.constant 1 : i32
    %3 = arith.select %2, %c1_i32, %c16_i32 : i32
    %4 = vector.broadcast %3 : i32 to vector<1x256xi32>
    %5 = arith.remsi %1, %4 : vector<1x256xi32>
    %c0_i32_1 = arith.constant 0 : i32
    %6 = vector.broadcast %c0_i32_1 : i32 to vector<1x256xi32>
    %7 = arith.cmpi ne, %5, %6 : vector<1x256xi32>
    %c0_i32_2 = arith.constant 0 : i32
    %8 = vector.broadcast %c0_i32_2 : i32 to vector<1x256xi32>
    %9 = arith.cmpi slt, %5, %8 : vector<1x256xi32>
    %c0_i32_3 = arith.constant 0 : i32
    %10 = arith.cmpi slt, %3, %c0_i32_3 : i32
    %11 = vector.broadcast %10 : i1 to vector<1x256xi1>
    %12 = vector.broadcast %11 : vector<1x256xi1> to vector<1x256xi1>
    %13 = arith.xori %9, %12 : vector<1x256xi1>
    %14 = arith.andi %13, %7 : vector<1x256xi1>
    %15 = vector.broadcast %3 : i32 to vector<1x256xi32>
    %16 = arith.addi %5, %15 : vector<1x256xi32>
    %17 = arith.select %14, %16, %5 : vector<1x256xi1>, vector<1x256xi32>
    %c15_i32 = arith.constant 15 : i32
    %18 = vector.broadcast %c15_i32 : i32 to vector<1x256xi32>
    %19 = arith.cmpi eq, %17, %18 : vector<1x256xi32>
    %c256_i32 = arith.constant 256 : i32
    %c0_i32_4 = arith.constant 0 : i32
    %20 = arith.cmpi eq, %c256_i32, %c0_i32_4 : i32
    %c1_i32_5 = arith.constant 1 : i32
    %21 = arith.select %20, %c1_i32_5, %c256_i32 : i32
    %22 = vector.broadcast %21 : i32 to vector<1x256xi32>
    %23 = arith.remsi %1, %22 : vector<1x256xi32>
    %c0_i32_6 = arith.constant 0 : i32
    %24 = vector.broadcast %c0_i32_6 : i32 to vector<1x256xi32>
    %25 = arith.cmpi ne, %23, %24 : vector<1x256xi32>
    %c0_i32_7 = arith.constant 0 : i32
    %26 = vector.broadcast %c0_i32_7 : i32 to vector<1x256xi32>
    %27 = arith.cmpi slt, %23, %26 : vector<1x256xi32>
    %c0_i32_8 = arith.constant 0 : i32
    %28 = arith.cmpi slt, %21, %c0_i32_8 : i32
    %29 = vector.broadcast %28 : i1 to vector<1x256xi1>
    %30 = vector.broadcast %29 : vector<1x256xi1> to vector<1x256xi1>
    %31 = arith.xori %27, %30 : vector<1x256xi1>
    %32 = arith.andi %31, %25 : vector<1x256xi1>
    %33 = vector.broadcast %21 : i32 to vector<1x256xi32>
    %34 = arith.addi %23, %33 : vector<1x256xi32>
    %35 = arith.select %32, %34, %23 : vector<1x256xi1>, vector<1x256xi32>
    %c240_i32 = arith.constant 240 : i32
    %36 = vector.broadcast %c240_i32 : i32 to vector<1x256xi32>
    %37 = arith.cmpi sge, %35, %36 : vector<1x256xi32>
    %c255_i32 = arith.constant 255 : i32
    %38 = tpu.dynamic_rotate %0 by %c255_i32 dim 1 : vector<8x256xf32>, i32 -> vector<8x256xf32>
    %39 = vector.shape_cast %19 : vector<1x256xi1> to vector<1x256xi1>
    %40 = vector.broadcast %39 : vector<1x256xi1> to vector<8x256xi1>
    %41 = arith.select %40, %0, %38 : vector<8x256xi1>, vector<8x256xf32>
    %42 = arith.maximumf %0, %41 : vector<8x256xf32>
    %c240_i32_9 = arith.constant 240 : i32
    %43 = tpu.dynamic_rotate %42 by %c240_i32_9 dim 1 : vector<8x256xf32>, i32 -> vector<8x256xf32>
    %44 = vector.shape_cast %37 : vector<1x256xi1> to vector<1x256xi1>
    %45 = vector.broadcast %44 : vector<1x256xi1> to vector<8x256xi1>
    %46 = arith.select %45, %42, %43 : vector<8x256xi1>, vector<8x256xf32>
    %47 = arith.maximumf %42, %46 : vector<8x256xf32>
    %c0_10 = arith.constant 0 : index
    %c0_11 = arith.constant 0 : index
    %48 = vector.load %arg2[%c0_10, %c0_11] : memref<8x256xf32, #tpu.memory_space<vmem>>, vector<8x256xf32>
    tpu.vector_store %arg2[%c0_10, %c0_11], %47 {strides = array<i32>} : memref<8x256xf32, #tpu.memory_space<vmem>>, vector<8x256xf32>,
    return
  }
  func.func @transform_0(%arg0: i32) -> (i32, i32) {
    %c0_i32 = arith.constant 0 : i32
    %c0_i32_0 = arith.constant 0 : i32
    return %arg0, %c0_i32 : i32, i32
  }
  func.func @transform_1(%arg0: i32) -> (i32, i32) {
    %c0_i32 = arith.constant 0 : i32
    %c0_i32_0 = arith.constant 0 : i32
    return %arg0, %c0_i32 : i32, i32
  }
}

</mosaic_0001>

<bundles_post_ra>
// kernel: tpu_custom_call.1
= control target key start
LH: loop header
LB: loop body
LE: loop exit
PB: predicated region body
PF: predicated region fallthrough
CT: control target
= control target key end

     0   :  { %6 = vsyncpa [#allocation3], 0  ;;  %s215_s0 = inlined_call_operand.hbm [shape: f32[8,256], index: 0, kind: input, shape index: {}]   ;;  %s216_s1 = inlined_call_operand.hbm [shape: f32[8,256], index: 1, kind: output, shape index: {}]  }
   0x1   :  { %7 = vsyncpa [#allocation4], 0  ;;  %s177_s6 = smov [#allocation2]   ;;  %s129_s10 = scalar_lea.hbm %s215_s0, 256 }
   0x2   :  { %s14_s7 = sshll.u32 %s177_s6, 4  ;;  %p130_p0 = scmp.ne.s32.totalorder %s215_s0, %s129_s10  ;;  %s15_s7 = int_to_ptr.vmem [resolvable:$true] %s14_s7 }
   0x3   :  { %p133_p1 = scmp.lt.u32.totalorder %s129_s10, %s215_s0 }
   0x5   :  { %p135_p2 = pnand %p133_p1, %p130_p0 }
   0x7   :  { %138 = shalt.err (!%p135_p2)
}
   0x8   :  { %s139_s15 = scalar_lea.vmem %s15_s7, 256  ;;  %p144_p4 = scmp.lt.s32.totalorder %s15_s7, %s15_s7 }
   0x9   :  { %p140_p3 = scmp.ne.s32.totalorder %s15_s7, %s139_s15  ;;  %p145_p5 = scmp.lt.s32.totalorder %s139_s15, %s139_s15 }
   0xb   :  { %p146_p6 = por %p145_p5, %p144_p4 }
   0xd   :  { %p147_p7 = pnand %p146_p6, %p140_p3 }
   0xf   :  { %150 = shalt.err (!%p147_p7)
}
  0x10   :  { %17 = dma.hbm_to_vmem [thread:$0]  %s215_s0, 256, %s15_s7, [#allocation3]  }
  0x11   :  { %173 = dma.done.wait [#allocation3], 256  }
  0x12   :  { %174 = vsyncadd [#allocation3], 4294967040  ;;  %v21_v0 = vld [vmem:[#allocation2] sm:$0xff]  ;;  %s178_s18 = smov 127   ;;  %v22_v1 = vld [vmem:[#allocation2 + $0x8] sm:$0xff]  ;;  %v23_v2 = vlaneseq  ;;  %s179_s0 = smov 112  }
  0x13   :  { %78 = vrot.lane.b32.xlu0 %v21_v0, %s178_s18  ;;  %s180_s19 = smov [#allocation5]  }
  0x14   :  { %v24_v3 = vand.u32 127, %v23_v2  ;;  %s116_s20 = sshll.u32 %s180_s19, 4  ;;  %s117_s20 = int_to_ptr.vmem [resolvable:$true] %s116_s20 }
  0x15   :  { %s151_s21 = scalar_lea.vmem %s117_s20, 256  ;;  %p156_p9 = scmp.lt.s32.totalorder %s117_s20, %s117_s20 }
  0x16   :  { %v25_v4 = vadd.s32 128, %v24_v3  ;;  %v30_v5 = vand.u32 15, %v24_v3  ;;  %vm82_vm0 = vcmp.lt.s32.totalorder %v24_v3, 127  ;;  %vm97_vm3 = vcmp.lt.s32.totalorder %v24_v3, 112  ;;  %p152_p8 = scmp.ne.s32.totalorder %s117_s20, %s151_s21  ;;  %p157_p10 = scmp.lt.s32.totalorder %s151_s21, %s151_s21 }
  0x17   :  { %80 = vrot.lane.b32.xlu0 %v22_v1, %s178_s18 }
  0x18   :  { %v37_v7 = vand.u32 15, %v25_v4  ;;  %vm50_vm1 = vcmp.eq.s32.totalorder %v30_v5, 15  ;;  %v63_v15 = vand.u32 255, %v25_v4  ;;  %p158_p11 = por %p157_p10, %p156_p9 }
  0x1a   :  { %vm51_vm2 = vcmp.eq.s32.totalorder %v37_v7, 15  ;;  %vm77_vm4 = vcmp.ge.s32.totalorder %v63_v15, 240  ;;  %p159_p12 = pnand %p158_p11, %p152_p8 }
  0x85   :  { %v79_v6 = vpop.permute.xlu0 %78 }
  0x89   :  { %v81_v8 = vpop.permute.xlu0 %80 }
  0x8a   :  { %v83_v9 = vsel %vm82_vm0, %v79_v6, %v81_v8  ;;  %v84_v10 = vsel %vm82_vm0, %v81_v8, %v79_v6 }
  0x8b   :  { %v89_v11 = vsel %vm50_vm1, %v21_v0, %v83_v9  ;;  %v90_v13 = vsel %vm51_vm2, %v22_v1, %v84_v10 }
  0x8c   :  { %v91_v12 = vmax.f32 %v21_v0, %v89_v11  ;;  %v92_v14 = vmax.f32 %v22_v1, %v90_v13 }
  0x8e   :  { %93 = vrot.lane.b32.xlu1 %v91_v12, %s179_s0 }
  0x92   :  { %95 = vrot.lane.b32.xlu1 %v92_v14, %s179_s0 }
 0x100   :  { %v94_v16 = vpop.permute.xlu1 %93 }
 0x104   :  { %v96_v17 = vpop.permute.xlu1 %95 }
 0x105   :  { %v98_v18 = vsel %vm97_vm3, %v94_v16, %v96_v17  ;;  %v99_v19 = vsel %vm97_vm3, %v96_v17, %v94_v16 }
 0x106   :  { %v105_v20 = vsel %vm77_vm4, %v92_v14, %v99_v19  ;;  %v106_v21 = vmax.f32 %v91_v12, %v98_v18 }
 0x107   :  { %v107_v22 = vmax.f32 %v92_v14, %v105_v20 }
 0x108   :  { %108 = vst [vmem:[#allocation5] sm:$0xff] %v106_v21 }
 0x109   :  { %109 = vst [vmem:[#allocation5 + $0x8] sm:$0xff] %v107_v22 }
 0x10a   :  { %162 = shalt.err (!%p159_p12)
}
 0x10b   :  { %s163_s24 = scalar_lea.hbm %s216_s1, 256 }
 0x10c   :  { %p164_p13 = scmp.ne.s32.totalorder %s216_s1, %s163_s24  ;;  %p167_p0 = scmp.lt.u32.totalorder %s163_s24, %s216_s1 }
 0x10e   :  { %p169_p1 = pnand %p167_p0, %p164_p13 }
 0x110   :  { %172 = shalt.err (!%p169_p1)
}
 0x111   :  { %119 = dma.vmem_to_hbm [thread:$0]  %s117_s20, 256, %s216_s1, [#allocation4]  }
 0x112   :  { %175 = dma.done.wait [#allocation4], 256  }
 0x113   :  { %176 = vsyncadd [#allocation4], 4294967040 }
 0x114   :  { %123 = vsyncpa [#allocation3], 1 }
 0x115   :  { %124 = vsyncpa [#allocation4], 1 }

</bundles_post_ra>
